<compile_context>
chip_gen: v7x
topology: tpu7x:2x2x1
jax: 0.10.0
libtpu: 0.0.40
codegen_flags: <defaults>
</compile_context>

<pallas_src>
import math

import jax
import jax.numpy as jnp
from jax.experimental import pallas as pl
from jax.experimental.pallas import tpu as pltpu

EPS = 1e-6
_WPAD = 8   # sublane-aligned row offset of the first packed weight segment


# ----------------------------------------------------------------------------
# Kernel
# ----------------------------------------------------------------------------
def _torch_layernorm(h, gamma, beta):
    """Matches the custom PyTorch LayerNorm: a_2*(x-mean)/(std+eps)+b_2,
    std unbiased (n-1). EUP reciprocal + multiply instead of VPU divide."""
    n = h.shape[-1]
    mean = jnp.mean(h, axis=-1, keepdims=True)
    d = h - mean
    var = jnp.sum(d * d, axis=-1, keepdims=True) * (1.0 / (n - 1))
    std = jnp.sqrt(var)
    inv = pl.reciprocal(std + EPS, approx=True)
    return gamma * (d * inv) + beta


def encoder_kernel(x_ref, pe_ref, w_pack_ref, v_pack_ref, out_ref):
    F = x_ref.shape[-1]
    D = pe_ref.shape[-1]
    Dh = D // 2
    C = out_ref.shape[-1]

    # --- unpack VMEM-resident packed parameters (static slices) -----------
    w_emb = w_pack_ref[0:F, :]                            # (F, D)
    w1 = w_pack_ref[_WPAD:_WPAD + D, 0:Dh]                # (D, Dh)
    w2 = w_pack_ref[_WPAD + D:_WPAD + D + Dh, 0:C]        # (Dh, C)

    b_emb = v_pack_ref[0:1, :]                            # (1, D)
    g_emb = v_pack_ref[1:2, :]
    be_emb = v_pack_ref[2:3, :]
    b1 = v_pack_ref[3:4, 0:Dh]                            # (1, Dh)
    g1 = v_pack_ref[4:5, 0:Dh]
    be1 = v_pack_ref[5:6, 0:Dh]
    b2 = v_pack_ref[6:7, 0:C]                             # (1, C)

    x = x_ref[...]                                        # (TM, F)

    # --- SrcEmbed: Linear + LayerNorm -------------------------------------
    h = jnp.dot(x, w_emb, preferred_element_type=jnp.float32) + b_emb   # (TM, D)
    h = _torch_layernorm(h, g_emb, be_emb)

    # --- PositionalEncoding (dropout is identity at inference) ------------
    # TM is a multiple of S and tiles start at sequence boundaries, so the
    # host-tiled pe slab lines up with the rows of this block.
    h = h + pe_ref[...]

    # TODO(synk): the N stacked `layer` modules are caller-supplied (their class is not
    # defined in Transformer_build.py), so the encoder-layer loop is treated as identity.

    # --- TranFinalLayer ----------------------------------------------------
    h1 = jnp.dot(h, w1, preferred_element_type=jnp.float32) + b1        # (TM, Dh)
    h1 = jnp.maximum(h1, 0.0)
    h1 = _torch_layernorm(h1, g1, be1)

    logits = jnp.dot(h1, w2, preferred_element_type=jnp.float32) + b2   # (TM, C)

    m = jnp.max(logits, axis=-1, keepdims=True)
    e = jnp.exp(logits - m)
    denom_inv = pl.reciprocal(jnp.sum(e, axis=-1, keepdims=True), approx=True)
    out_ref[...] = e * denom_inv
    # TODO(synk): output stores are 4/128-lane masked vst; a lane-dense
    # (TM*C/128, 128) relayout was skipped because the required in-kernel reshape
    # of the tiled dims risks unsupported Mosaic lowering.


# ----------------------------------------------------------------------------
# Host-side helpers
# ----------------------------------------------------------------------------
def make_positional_encoding(seq_len, d_model):
    position = jnp.arange(seq_len, dtype=jnp.float32)[:, None]          # (S, 1)
    div_term = jnp.exp(jnp.arange(0, d_model, 2, dtype=jnp.float32)
                       * (-math.log(10000.0) / d_model))                # (D/2,)
    pe = jnp.zeros((seq_len, d_model), dtype=jnp.float32)
    pe = pe.at[:, 0::2].set(jnp.sin(position * div_term))
    pe = pe.at[:, 1::2].set(jnp.cos(position * div_term))
    return pe


def init_params(key, num_features, d_model, num_classes):
    """Deterministic synthetic init (PyTorch-Linear-style uniform bounds)."""
    ks = jax.random.split(key, 6)

    def linear(kw, kb, fan_in, fan_out):
        bound = 1.0 / math.sqrt(fan_in)
        w = jax.random.uniform(kw, (fan_in, fan_out), jnp.float32, -bound, bound)
        b = jax.random.uniform(kb, (1, fan_out), jnp.float32, -bound, bound)
        return w, b

    d_half = d_model // 2
    w_emb, b_emb = linear(ks[0], ks[1], num_features, d_model)
    w1, b1 = linear(ks[2], ks[3], d_model, d_half)
    w2, b2 = linear(ks[4], ks[5], d_half, num_classes)

    return dict(
        w_emb=w_emb, b_emb=b_emb,
        g_emb=jnp.ones((1, d_model), jnp.float32),
        be_emb=jnp.zeros((1, d_model), jnp.float32),
        w1=w1, b1=b1,
        g1=jnp.ones((1, d_half), jnp.float32),
        be1=jnp.zeros((1, d_half), jnp.float32),
        w2=w2, b2=b2,
    )


def _pack_params(params):
    """Pack the 10 tiny parameter tensors into two constant arrays."""
    F, D = params["w_emb"].shape
    Dh = params["w1"].shape[1]
    C = params["w2"].shape[1]

    w_pack = jnp.zeros((_WPAD + D + Dh, D), jnp.float32)
    w_pack = w_pack.at[0:F, :].set(params["w_emb"])
    w_pack = w_pack.at[_WPAD:_WPAD + D, 0:Dh].set(params["w1"])
    w_pack = w_pack.at[_WPAD + D:_WPAD + D + Dh, 0:C].set(params["w2"])

    v_pack = jnp.zeros((8, D), jnp.float32)
    v_pack = v_pack.at[0, :].set(params["b_emb"].reshape(-1))
    v_pack = v_pack.at[1, :].set(params["g_emb"].reshape(-1))
    v_pack = v_pack.at[2, :].set(params["be_emb"].reshape(-1))
    v_pack = v_pack.at[3, 0:Dh].set(params["b1"].reshape(-1))
    v_pack = v_pack.at[4, 0:Dh].set(params["g1"].reshape(-1))
    v_pack = v_pack.at[5, 0:Dh].set(params["be1"].reshape(-1))
    v_pack = v_pack.at[6, 0:C].set(params["b2"].reshape(-1))
    return w_pack, v_pack


def _choose_row_tile(M, S, target=4096):
    """Row tile: multiple of lcm(S, 8), close to `target`, but small enough that the
    grid keeps at least 2 steps (v7x has 2 TensorCores)."""
    q = (S * 8) // math.gcd(S, 8)            # lcm(S, 8)
    tm = min(target, max(q, (M + 1) // 2))
    tm = max(q, (tm // q) * q)
    return tm


def encoder_forward(x, params, *, row_tile_target=4096):
    """x: (B, S, num_features) f32 -> (B, S, num_classes) f32."""
    B, S, F = x.shape
    D = params["w_emb"].shape[1]
    C = params["w2"].shape[1]

    M = B * S
    TM = _choose_row_tile(M, S, row_tile_target)
    n_steps = -(-M // TM)
    M_pad = n_steps * TM

    x2 = x.reshape(M, F).astype(jnp.float32)
    if M_pad > M:
        x2 = jnp.pad(x2, ((0, M_pad - M), (0, 0)))

    # Positional encoding, host-tiled to one row tile; VMEM-resident in the kernel.
    pe = make_positional_encoding(S, D)
    pe_rep = jnp.tile(pe, (TM // S, 1))                   # (TM, D)

    w_pack, v_pack = _pack_params(params)

    row_map = lambda i: (i, 0)
    const_map = lambda i: (0, 0)                          # VMEM-resident constants

    out = pl.pallas_call(
        encoder_kernel,
        out_shape=jax.ShapeDtypeStruct((M_pad, C), jnp.float32),
        grid=(n_steps,),
        in_specs=[
            pl.BlockSpec((TM, F), row_map),               # x rows
            pl.BlockSpec((TM, D), const_map),             # tiled positional encoding
            pl.BlockSpec(w_pack.shape, const_map),        # packed weights
            pl.BlockSpec(v_pack.shape, const_map),        # packed bias/scale vectors
        ],
        out_specs=pl.BlockSpec((TM, C), row_map),
        compiler_params=pltpu.CompilerParams(
            dimension_semantics=("parallel",)),
    )(x2, pe_rep, w_pack, v_pack)

    return out[:M].reshape(B, S, C)


# ----------------------------------------------------------------------------
# Pure-JAX reference (exact divisions) for validation
# ----------------------------------------------------------------------------
def encoder_reference(x, params):
    S = x.shape[1]
    D = params["w_emb"].shape[1]
    pe = make_positional_encoding(S, D)

    def ln(h, g, b):
        n = h.shape[-1]
        mean = jnp.mean(h, axis=-1, keepdims=True)
        d = h - mean
        std = jnp.sqrt(jnp.sum(d * d, axis=-1, keepdims=True) / (n - 1))
        return g * d / (std + EPS) + b

    h = x @ params["w_emb"] + params["b_emb"]
    h = ln(h, params["g_emb"], params["be_emb"])
    h = h + pe[None, :, :]
    h1 = jnp.maximum(h @ params["w1"] + params["b1"], 0.0)
    h1 = ln(h1, params["g1"], params["be1"])
    logits = h1 @ params["w2"] + params["b2"]
    return jax.nn.softmax(logits, axis=-1)


if __name__ == "__main__":
    num_features, d_model, num_classes = 4, 32, 4
    key = jax.random.PRNGKey(0)
    k_p, k1, k2, k3 = jax.random.split(key, 4)
    params = init_params(k_p, num_features, d_model, num_classes)

    # Case 1: B=2, S=8 -> M=16, TM=8, 2 grid steps.
    x1 = jax.random.normal(k1, (2, 8, num_features), dtype=jnp.float32)
    o1 = jax.block_until_ready(encoder_forward(x1, params))
    r1 = encoder_reference(x1, params)
    assert o1.shape == (2, 8, num_classes)
    assert bool(jnp.allclose(jnp.sum(o1, axis=-1), 1.0, atol=5e-3))
    assert bool(jnp.allclose(o1, r1, atol=5e-3, rtol=5e-3))

    # Case 2: B=2, S=16 -> M=32, TM=16, 2 grid steps (different pe tiling).
    x2 = jax.random.normal(k2, (2, 16, num_features), dtype=jnp.float32)
    o2 = jax.block_until_ready(encoder_forward(x2, params))
    r2 = encoder_reference(x2, params)
    assert o2.shape == (2, 16, num_classes)
    assert bool(jnp.allclose(o2, r2, atol=5e-3, rtol=5e-3))

    # Case 3: B=5, S=8 -> M=40, TM=16, M_pad=48 (exercises the row-padding path).
    x3 = jax.random.normal(k3, (5, 8, num_features), dtype=jnp.float32)
    o3 = jax.block_until_ready(encoder_forward(x3, params))
    r3 = encoder_reference(x3, params)
    assert o3.shape == (5, 8, num_classes)
    assert bool(jnp.allclose(o3, r3, atol=5e-3, rtol=5e-3))

    print("KERNEL_OK")
</pallas_src>

<mosaic_0001>
module attributes {stable_mosaic.version = 11 : i64} {
  func.func @encoder_kernel(%arg0: i32, %arg1: memref<8x4xf32, #tpu.memory_space<vmem>>, %arg2: memref<8x32xf32, #tpu.memory_space<vmem>>, %arg3: memref<56x32xf32, #tpu.memory_space<vmem>>, %arg4: memref<8x32xf32, #tpu.memory_space<vmem>>, %arg5: memref<8x4xf32, #tpu.memory_space<vmem>>) attributes {dimension_semantics = [#tpu.dimension_semantics<parallel>], iteration_bounds = array<i64: 2>, scalar_prefetch = 0 : i64, scratch_operands = 0 : i64, tpu.core_type = #tpu.core_type<tc>, window_params = [{transform_indices = @transform_0, window_bounds = array<i64: 8, 4>}, {pipeline_mode = #tpu.pipeline_mode<synchronous>, transform_indices = @transform_1, window_bounds = array<i64: 8, 32>}, {pipeline_mode = #tpu.pipeline_mode<synchronous>, transform_indices = @transform_2, window_bounds = array<i64: 56, 32>}, {pipeline_mode = #tpu.pipeline_mode<synchronous>, transform_indices = @transform_3, window_bounds = array<i64: 8, 32>}, {transform_indices = @transform_4, window_bounds = array<i64: 8, 4>}]} {
    %c0 = arith.constant 0 : index
    %c0_0 = arith.constant 0 : index
    %0 = vector.load %arg3[%c0, %c0_0] : memref<56x32xf32, #tpu.memory_space<vmem>>, vector<4x32xf32>
    %c8 = arith.constant 8 : index
    %c0_1 = arith.constant 0 : index
    %1 = vector.load %arg3[%c8, %c0_1] : memref<56x32xf32, #tpu.memory_space<vmem>>, vector<32x16xf32>
    %c40 = arith.constant 40 : index
    %c0_2 = arith.constant 0 : index
    %2 = vector.load %arg3[%c40, %c0_2] : memref<56x32xf32, #tpu.memory_space<vmem>>, vector<16x4xf32>
    %c0_3 = arith.constant 0 : index
    %c0_4 = arith.constant 0 : index
    %3 = vector.load %arg4[%c0_3, %c0_4] : memref<8x32xf32, #tpu.memory_space<vmem>>, vector<1x32xf32>
    %c1 = arith.constant 1 : index
    %c0_5 = arith.constant 0 : index
    %4 = vector.load %arg4[%c1, %c0_5] : memref<8x32xf32, #tpu.memory_space<vmem>>, vector<1x32xf32>
    %c2 = arith.constant 2 : index
    %c0_6 = arith.constant 0 : index
    %5 = vector.load %arg4[%c2, %c0_6] : memref<8x32xf32, #tpu.memory_space<vmem>>, vector<1x32xf32>
    %c3 = arith.constant 3 : index
    %c0_7 = arith.constant 0 : index
    %6 = vector.load %arg4[%c3, %c0_7] : memref<8x32xf32, #tpu.memory_space<vmem>>, vector<1x16xf32>
    %c4 = arith.constant 4 : index
    %c0_8 = arith.constant 0 : index
    %7 = vector.load %arg4[%c4, %c0_8] : memref<8x32xf32, #tpu.memory_space<vmem>>, vector<1x16xf32>
    %c5 = arith.constant 5 : index
    %c0_9 = arith.constant 0 : index
    %8 = vector.load %arg4[%c5, %c0_9] : memref<8x32xf32, #tpu.memory_space<vmem>>, vector<1x16xf32>
    %c6 = arith.constant 6 : index
    %c0_10 = arith.constant 0 : index
    %9 = vector.load %arg4[%c6, %c0_10] : memref<8x32xf32, #tpu.memory_space<vmem>>, vector<1x4xf32>
    %c0_11 = arith.constant 0 : index
    %c0_12 = arith.constant 0 : index
    %10 = vector.load %arg1[%c0_11, %c0_12] : memref<8x4xf32, #tpu.memory_space<vmem>>, vector<8x4xf32>
    %cst = arith.constant dense<0.000000e+00> : vector<8x32xf32>
    %11 = tpu.matmul %10, %0, %cst {dimension_numbers = #tpu.dot_dimension_numbers<[1], [0], [0], [1], [0, 0, 1, 1], [], []>} : vector<8x4xf32>, vector<4x32xf32>, vector<8x32xf32> -> vector<8x32xf32>
    %12 = vector.broadcast %3 : vector<1x32xf32> to vector<8x32xf32>
    %13 = arith.addf %11, %12 : vector<8x32xf32>
    %cst_13 = arith.constant dense<0.000000e+00> : vector<8xf32>
    %14 = vector.multi_reduction <add>, %13, %cst_13 [1] : vector<8x32xf32> to vector<8xf32>
    %15 = vector.shape_cast %14 : vector<8xf32> to vector<8x1xf32>
    %cst_14 = arith.constant 3.200000e+01 : f32
    %16 = vector.broadcast %cst_14 : f32 to vector<8x1xf32>
    %17 = arith.divf %15, %16 : vector<8x1xf32>
    %18 = vector.broadcast %17 : vector<8x1xf32> to vector<8x32xf32>
    %19 = arith.subf %13, %18 : vector<8x32xf32>
    %20 = arith.mulf %19, %19 : vector<8x32xf32>
    %cst_15 = arith.constant dense<0.000000e+00> : vector<8xf32>
    %21 = vector.multi_reduction <add>, %20, %cst_15 [1] : vector<8x32xf32> to vector<8xf32>
    %22 = vector.shape_cast %21 : vector<8xf32> to vector<8x1xf32>
    %cst_16 = arith.constant 0.0322580636 : f32
    %23 = vector.broadcast %cst_16 : f32 to vector<8x1xf32>
    %24 = arith.mulf %22, %23 : vector<8x1xf32>
    %25 = math.sqrt %24 : vector<8x1xf32>
    %cst_17 = arith.constant 9.99999997E-7 : f32
    %26 = vector.broadcast %cst_17 : f32 to vector<8x1xf32>
    %27 = arith.addf %25, %26 : vector<8x1xf32>
    %28 = tpu.reciprocal %27 {approx = true} : vector<8x1xf32> -> vector<8x1xf32>
    %29 = vector.broadcast %28 : vector<8x1xf32> to vector<8x32xf32>
    %30 = arith.mulf %19, %29 : vector<8x32xf32>
    %31 = vector.broadcast %4 : vector<1x32xf32> to vector<8x32xf32>
    %32 = arith.mulf %31, %30 : vector<8x32xf32>
    %33 = vector.broadcast %5 : vector<1x32xf32> to vector<8x32xf32>
    %34 = arith.addf %32, %33 : vector<8x32xf32>
    %c0_18 = arith.constant 0 : index
    %c0_19 = arith.constant 0 : index
    %35 = vector.load %arg2[%c0_18, %c0_19] : memref<8x32xf32, #tpu.memory_space<vmem>>, vector<8x32xf32>
    %36 = arith.addf %34, %35 : vector<8x32xf32>
    %cst_20 = arith.constant dense<0.000000e+00> : vector<8x16xf32>
    %37 = tpu.matmul %36, %1, %cst_20 {dimension_numbers = #tpu.dot_dimension_numbers<[1], [0], [0], [1], [0, 0, 1, 1], [], []>} : vector<8x32xf32>, vector<32x16xf32>, vector<8x16xf32> -> vector<8x16xf32>
    %38 = vector.broadcast %6 : vector<1x16xf32> to vector<8x16xf32>
    %39 = arith.addf %37, %38 : vector<8x16xf32>
    %cst_21 = arith.constant 0.000000e+00 : f32
    %40 = vector.broadcast %cst_21 : f32 to vector<8x16xf32>
    %41 = arith.maximumf %39, %40 : vector<8x16xf32>
    %cst_22 = arith.constant dense<0.000000e+00> : vector<8xf32>
    %42 = vector.multi_reduction <add>, %41, %cst_22 [1] : vector<8x16xf32> to vector<8xf32>
    %43 = vector.shape_cast %42 : vector<8xf32> to vector<8x1xf32>
    %cst_23 = arith.constant 1.600000e+01 : f32
    %44 = vector.broadcast %cst_23 : f32 to vector<8x1xf32>
    %45 = arith.divf %43, %44 : vector<8x1xf32>
    %46 = vector.broadcast %45 : vector<8x1xf32> to vector<8x16xf32>
    %47 = arith.subf %41, %46 : vector<8x16xf32>
    %48 = arith.mulf %47, %47 : vector<8x16xf32>
    %cst_24 = arith.constant dense<0.000000e+00> : vector<8xf32>
    %49 = vector.multi_reduction <add>, %48, %cst_24 [1] : vector<8x16xf32> to vector<8xf32>
    %50 = vector.shape_cast %49 : vector<8xf32> to vector<8x1xf32>
    %cst_25 = arith.constant 0.0666666701 : f32
    %51 = vector.broadcast %cst_25 : f32 to vector<8x1xf32>
    %52 = arith.mulf %50, %51 : vector<8x1xf32>
    %53 = math.sqrt %52 : vector<8x1xf32>
    %cst_26 = arith.constant 9.99999997E-7 : f32
    %54 = vector.broadcast %cst_26 : f32 to vector<8x1xf32>
    %55 = arith.addf %53, %54 : vector<8x1xf32>
    %56 = tpu.reciprocal %55 {approx = true} : vector<8x1xf32> -> vector<8x1xf32>
    %57 = vector.broadcast %56 : vector<8x1xf32> to vector<8x16xf32>
    %58 = arith.mulf %47, %57 : vector<8x16xf32>
    %59 = vector.broadcast %7 : vector<1x16xf32> to vector<8x16xf32>
    %60 = arith.mulf %59, %58 : vector<8x16xf32>
    %61 = vector.broadcast %8 : vector<1x16xf32> to vector<8x16xf32>
    %62 = arith.addf %60, %61 : vector<8x16xf32>
    %cst_27 = arith.constant dense<0.000000e+00> : vector<8x4xf32>
    %63 = tpu.matmul %62, %2, %cst_27 {dimension_numbers = #tpu.dot_dimension_numbers<[1], [0], [0], [1], [0, 0, 1, 1], [], []>} : vector<8x16xf32>, vector<16x4xf32>, vector<8x4xf32> -> vector<8x4xf32>
    %64 = vector.broadcast %9 : vector<1x4xf32> to vector<8x4xf32>
    %65 = arith.addf %63, %64 : vector<8x4xf32>
    %cst_28 = arith.constant dense<0xFF800000> : vector<8xf32>
    %66 = vector.multi_reduction <maximumf>, %65, %cst_28 [1] : vector<8x4xf32> to vector<8xf32>
    %67 = vector.shape_cast %66 : vector<8xf32> to vector<8x1xf32>
    %68 = vector.broadcast %67 : vector<8x1xf32> to vector<8x4xf32>
    %69 = arith.subf %65, %68 : vector<8x4xf32>
    %70 = math.exp %69 : vector<8x4xf32>
    %cst_29 = arith.constant dense<0.000000e+00> : vector<8xf32>
    %71 = vector.multi_reduction <add>, %70, %cst_29 [1] : vector<8x4xf32> to vector<8xf32>
    %72 = vector.shape_cast %71 : vector<8xf32> to vector<8x1xf32>
    %73 = tpu.reciprocal %72 {approx = true} : vector<8x1xf32> -> vector<8x1xf32>
    %74 = vector.broadcast %73 : vector<8x1xf32> to vector<8x4xf32>
    %75 = arith.mulf %70, %74 : vector<8x4xf32>
    %c0_30 = arith.constant 0 : index
    %c0_31 = arith.constant 0 : index
    %76 = vector.load %arg5[%c0_30, %c0_31] : memref<8x4xf32, #tpu.memory_space<vmem>>, vector<8x4xf32>
    tpu.vector_store %arg5[%c0_30, %c0_31], %75 {strides = array<i32>} : memref<8x4xf32, #tpu.memory_space<vmem>>, vector<8x4xf32>,
    return
  }
  func.func @transform_0(%arg0: i32) -> (i32, i32) {
    %c0_i32 = arith.constant 0 : i32
    %c0_i32_0 = arith.constant 0 : i32
    return %arg0, %c0_i32 : i32, i32
  }
  func.func @transform_1(%arg0: i32) -> (i32, i32) {
    %c0_i32 = arith.constant 0 : i32
    %c0_i32_0 = arith.constant 0 : i32
    %c0_i32_1 = arith.constant 0 : i32
    return %c0_i32, %c0_i32_0 : i32, i32
  }
  func.func @transform_2(%arg0: i32) -> (i32, i32) {
    %c0_i32 = arith.constant 0 : i32
    %c0_i32_0 = arith.constant 0 : i32
    %c0_i32_1 = arith.constant 0 : i32
    return %c0_i32, %c0_i32_0 : i32, i32
  }
  func.func @transform_3(%arg0: i32) -> (i32, i32) {
    %c0_i32 = arith.constant 0 : i32
    %c0_i32_0 = arith.constant 0 : i32
    %c0_i32_1 = arith.constant 0 : i32
    return %c0_i32, %c0_i32_0 : i32, i32
  }
  func.func @transform_4(%arg0: i32) -> (i32, i32) {
    %c0_i32 = arith.constant 0 : i32
    %c0_i32_0 = arith.constant 0 : i32
    return %arg0, %c0_i32 : i32, i32
  }
}

</mosaic_0001>

<bundles_post_ra>
// kernel: tpu_custom_call.1
= control target key start
LH: loop header
LB: loop body
LE: loop exit
PB: predicated region body
PF: predicated region fallthrough
CT: control target
= control target key end

     0   :  { %s697_s15 = smov 0   ;;  %s776_s0 = inlined_call_operand.vmem [shape: f32[16,4], index: 0, kind: input, shape index: {}]   ;;  %s777_s1 = inlined_call_operand.vmem [shape: f32[8,32], index: 1, kind: input, shape index: {}]   ;;  %s778_s2 = inlined_call_operand.vmem [shape: f32[56,32], index: 2, kind: input, shape index: {}]   ;;  %s779_s3 = inlined_call_operand.vmem [shape: f32[8,32], index: 3, kind: input, shape index: {}]   ;;  %s780_s4 = inlined_call_operand.vmem [shape: f32[16,4], index: 4, kind: output, shape index: {}]  }
   0x1 LB: > { %s576_s16 = sadd.s32 4294967295, %s667_s15   ;;  %p580_p0 = scmp.ge.s32.totalorder %s667_s15, 1  ;;  %s667_s15 = sphi %s697_s15, %s14_s15  }
   0x2   : > { %p161_p1 = scmp.lt.s32.totalorder %s667_s15, 3 }
   0x4   : > { %p162_p2 = pnand %p580_p0, %p161_p1 }
   0x5   : > { %v193_v0 = vld [vmem:[%s778_s2] sm:$0xf] (!%p162_p2)  ;;  %vm216_vm0 = vcmask (!%p162_p2), 1043456   ;;  %p185_p3 = scmp.lt.s32.totalorder (!%p162_p2), %s576_s16, 1  ;;  %v669_v1 = vmov (!%p162_p2), 0.0   ;;  %vm670_vm1 = vmmov (!%p162_p2), 0  }
   0x6   : > { %165 = sbr.rel (%p162_p2) target bundleno = 1634 (0x662), region = 36  ;;  %606 = vmatprep.subr.mxu0 (!%p162_p2), %v669_v1  ;;  %608 = vmatprep.mubr.msk.f32.mxu0 (!%p162_p2), %vm670_vm1, %v669_v1  ;;  %vm212_vm2 = vcmask (!%p162_p2), 31744   ;;  %v583_v3 = vld [vmem:[%s779_s3] ss:$0 sm:$0xff] (!%p162_p2)  ;;  %vm290_vm3 = vcmask (!%p162_p2), 261120   ;;  %v194_v13 = vld [vmem:[%s778_s2 + $0x8] sm:$0xff] (!%p162_p2) }
   0x7   : > { %607 = vmatpush3.msk.msra.mxu0 (!%p162_p2), %vm216_vm0, %v193_v0  ;;  %619 = vmatprep.mubr.msk.f32.mxu1 (!%p162_p2), %vm670_vm1, %v669_v1  ;;  %v195_v14 = vld [vmem:[%s778_s2 + $0x10] sm:$0xff] (!%p162_p2)  ;;  %v196_v15 = vld [vmem:[%s778_s2 + $0x18] sm:$0xff] (!%p162_p2)  ;;  %v671_v16 = vmov (!%p162_p2), 0.0|0.0   ;;  %v197_v18 = vld [vmem:[%s778_s2 + $0x20] sm:$0xff] (!%p162_p2)  ;;  %vm402_vm6 = vcmask (!%p162_p2), 130048  }
   0x8   : > { %629 = vmatprep.subr.bf16.mxu1 (!%p162_p2), %v671_v16  ;;  %v630_v17 = vpack.c.bf16 (!%p162_p2), %v195_v14, %v194_v13  ;;  %635 = vmatprep.subr.bf16.mxu0 (!%p162_p2), %v671_v16  ;;  %v633_v19 = vpack.c.bf16 (!%p162_p2), %v197_v18, %v196_v15  ;;  %v586_v29 = vld [vmem:[%s779_s3 + $0x1] ss:$0 sm:$0xff] (!%p162_p2)  ;;  %v587_v31 = vld [vmem:[%s779_s3 + $0x2] ss:$0 sm:$0xff] (!%p162_p2)  ;;  %v588_v36 = vld [vmem:[%s779_s3 + $0x3] ss:$0 sm:$0xff] (!%p162_p2) }
   0x9   : > { %v322_v33 = vld [vmem:[%s777_s1] sm:$0xff] (!%p162_p2)  ;;  %v198_v47 = vld [vmem:[%s778_s2 + $0x28] sm:$0xff] (!%p162_p2)  ;;  %v199_v48 = vld [vmem:[%s778_s2 + $0x30] sm:$0xff] (!%p162_p2) }
   0xa   : > { %631 = vmatpush3.bf16.msra.mxu1 (!%p162_p2), %v630_v17  ;;  %v636_v49 = vpack.c.bf16 (!%p162_p2), %v199_v48, %v198_v47  ;;  %v590_v59 = vld [vmem:[%s779_s3 + $0x4] ss:$0 sm:$0xff] (!%p162_p2)  ;;  %v591_v61 = vld [vmem:[%s779_s3 + $0x5] ss:$0 sm:$0xff] (!%p162_p2)  ;;  %v592_v0 = vld [vmem:[%s779_s3 + $0x6] ss:$0 sm:$0xff] (!%p162_p2) }
   0xb   : > { %632 = vmatprep.subr.bf16.mxu1 (!%p162_p2), %v671_v16 }
   0xd   : > { %s782_s16 = smov (!%p185_p3, %s576_s16), 1 }
   0xe   : > { %s581_s19 = sshll.u32 %s782_s16, 3  ;;  %634 = vmatpush3.bf16.msra.mxu1 %v633_v19 }
   0xf   : > { %s188_s22 = scalar_lea.vmem %s776_s0, %s581_s19  ;;  %s192_s30 = scalar_lea.vmem %s780_s4, %s581_s19 }
  0x10   : > { %v207_v2 = vld [vmem:[%s188_s22] sm:$0xff] }
  0x11   : > { %609 = vmatmul.mubr.msk.f32.vlgmr.msra.gmra.mrb[0].mxu0 %vm212_vm2, %v207_v2 }
  0x12   : > { %626 = vmatprep.mubr.msk.f32.mxu0 %vm670_vm1, %v669_v1  ;;  %637 = vmatpush3.bf16.msra.mxu0 %v636_v49 }
  0xe4   : > { %v286_v4 = vpop.f32.mrb[0].mxu0 }
  0xe5   : > { %v287_v5 = vadd.f32 %v583_v3, %v286_v4  ;;  %v610_v6 = vpop.f32.mrb[1].mxu0 }
  0xe7   : > { %v291_v7 = vsel %vm290_vm3, %v287_v5, 0.0 }
  0xe8   : > { %292 = vadd.xlane.f32.xlu0 %v291_v7 }
 0x175   : > { %v293_v8 = vpop.xlane.xlu0 %292 }
 0x176   : > { %v295_v9 = vmul.f32 0.03125, %v293_v8 }
 0x178   : > { %v296_v10 = vsub.f32 %v287_v5, %v295_v9 }
 0x17a   : > { %v297_v11 = vmul.f32 %v296_v10, %v296_v10 }
 0x17c   : > { %v298_v12 = vsel %vm290_vm3, %v297_v11, 0.0 }
 0x17d   : > { %299 = vadd.xlane.f32.xlu0 %v298_v12 }
 0x20a   : > { %v300_v20 = vpop.xlane.xlu0 %299 }
 0x20b   : > { %v301_v21 = vmul.f32 0.032258064, %v300_v20 }
 0x20d   : > { %649 = vrsqrt.f32 %v301_v21  ;;  %vm304_vm4 = vcmp.eq.f32.partialorder %v301_v21, inf  ;;  %v307_v24 = vand.u32 2147483648, %v301_v21  ;;  %vm306_vm5 = vcmp.eq.f32.partialorder %v301_v21, 0.0 }
 0x217   : > { %v650_v22 = vpop.eup %649 }
 0x218   : > { %v303_v23 = vmul.f32 %v650_v22, %v301_v21 }
 0x21a   : > { %v305_v25 = vsel %vm304_vm4, %v301_v21, %v303_v23 }
 0x21b   : > { %v308_v26 = vsel %vm306_vm5, %v307_v24, %v305_v25 }
 0x21c   : > { %v309_v27 = vadd.f32 1e-06, %v308_v26 }
 0x21e   : > { %651 = vrcp.f32 %v309_v27 }
 0x228   : > { %v652_v28 = vpop.eup %651 }
 0x229   : > { %v311_v30 = vmul.f32 %v652_v28, %v296_v10 }
 0x22b   : > { %v316_v32 = vmul.f32 %v586_v29, %v311_v30 }
 0x22d   : > { %v321_v34 = vadd.f32 %v587_v31, %v316_v32 }
 0x22f   : > { %v323_v35 = vadd.f32 %v322_v33, %v321_v34 }
 0x231   : > { %620 = vmatmul.mubr.msk.f32.vlgmr.msra.gmra.mrb[0].mxu1 %vm290_vm3, %v323_v35 }
 0x304   : > { %v397_v37 = vpop.f32.mrb[0].mxu1 }
 0x305   : > { %v398_v38 = vadd.f32 %v588_v36, %v397_v37  ;;  %v621_v39 = vpop.f32.mrb[1].mxu1 }
 0x307   : > { %v401_v40 = vmax.f32 %v398_v38, 0.0 }
 0x309   : > { %v403_v41 = vsel %vm402_vm6, %v401_v40, 0.0 }
 0x30a   : > { %404 = vadd.xlane.f32.xlu1 %v403_v41 }
 0x397   : > { %v405_v42 = vpop.xlane.xlu1 %404 }
 0x398   : > { %v407_v43 = vmul.f32 0.0625, %v405_v42 }
 0x39a   : > { %v408_v44 = vsub.f32 %v401_v40, %v407_v43 }
 0x39c   : > { %v409_v45 = vmul.f32 %v408_v44, %v408_v44 }
 0x39e   : > { %v410_v46 = vsel %vm402_vm6, %v409_v45, 0.0 }
 0x39f   : > { %411 = vadd.xlane.f32.xlu1 %v410_v46 }
 0x42c   : > { %v412_v50 = vpop.xlane.xlu1 %411 }
 0x42d   : > { %v413_v51 = vmul.f32 0.06666667, %v412_v50 }
 0x42f   : > { %653 = vrsqrt.f32 %v413_v51  ;;  %vm416_vm7 = vcmp.eq.f32.partialorder %v413_v51, inf  ;;  %v419_v54 = vand.u32 2147483648, %v413_v51  ;;  %vm418_vm8 = vcmp.eq.f32.partialorder %v413_v51, 0.0 }
 0x439   : > { %v654_v52 = vpop.eup %653 }
 0x43a   : > { %v415_v53 = vmul.f32 %v654_v52, %v413_v51 }
 0x43c   : > { %v417_v55 = vsel %vm416_vm7, %v413_v51, %v415_v53 }
 0x43d   : > { %v420_v56 = vsel %vm418_vm8, %v419_v54, %v417_v55 }
 0x43e   : > { %v421_v57 = vadd.f32 1e-06, %v420_v56 }
 0x440   : > { %655 = vrcp.f32 %v421_v57 }
 0x44a   : > { %v656_v58 = vpop.eup %655 }
 0x44b   : > { %v423_v60 = vmul.f32 %v656_v58, %v408_v44 }
 0x44d   : > { %v428_v62 = vmul.f32 %v590_v59, %v423_v60 }
 0x44f   : > { %v433_v63 = vadd.f32 %v591_v61, %v428_v62 }
 0x451   : > { %627 = vmatmul.mubr.msk.f32.vlgmr.msra.gmra.mrb[2].mxu0 %vm402_vm6, %v433_v63 }
 0x524   : > { %v507_v1 = vpop.f32.mrb[2].mxu0 }
 0x525   : > { %v508_v2 = vadd.f32 %v592_v0, %v507_v1  ;;  %v628_v3 = vpop.f32.mrb[3].mxu0 }
 0x527   : > { %v511_v4 = vsel %vm212_vm2, %v508_v2, -inf }
 0x528   : > { %512 = vmax.xlane.f32.xlu0 %v511_v4 }
 0x5b5   : > { %v513_v5 = vpop.xlane.xlu0 %512 }
 0x5b6   : > { %v514_v6 = vsub.f32 %v508_v2, %v513_v5 }
 0x5b8   : > { %v515_v7 = vmul.f32 1.442695, %v514_v6 }
 0x5ba   : > { %657 = vpow2.f32 %v515_v7 }
 0x5c4   : > { %v658_v8 = vpop.eup %657 }
 0x5c5   : > { %v517_v9 = vsel %vm212_vm2, %v658_v8, 0.0 }
 0x5c6   : > { %518 = vadd.xlane.f32.xlu1 %v517_v9 }
 0x653   : > { %v519_v10 = vpop.xlane.xlu1 %518 }
 0x654   : > { %659 = vrcp.f32 %v519_v10 }
 0x65e   : > { %v660_v11 = vpop.eup %659 }
 0x65f   : > { %v521_v12 = vmul.f32 %v660_v11, %v658_v8 }
 0x661   : > { %522 = vst.msk [vmem:[%s192_s30] sm:$0xff] %vm212_vm2, %v521_v12 }
 0x662 PF: > { %s14_s15 = sadd.s32 1, %s667_s15  }
 0x663   : > { %p11_p4 = scmp.ge.s32.totalorder %s14_s15, 4  }
 0x665   :  { %13 = sbr.rel (!%p11_p4) target bundleno = 1 (0x1), region = 66 }

</bundles_post_ra>
